<compile_context>
chip_gen: v5e
topology: v5e:2x2
jax: 0.10.0
libtpu: 0.0.40
codegen_flags: <defaults>
</compile_context>

<pallas_src>
import jax
import jax.numpy as jnp
from jax.experimental import pallas as pl
from jax.experimental.pallas import tpu as pltpu

LANE = 128
# ~1M elements per block buffer (4 MiB for f32). Double-buffered in+out ≈ 16 MiB.
BLOCK_ELEMS = 1024 * 1024
# Explicit scoped-VMEM limit: safe on all of v5e/v6e/v7x, raises v5e's 16 MiB default.
VMEM_LIMIT_BYTES = 32 * 1024 * 1024

# Sublane packing multiple per element size (f32 -> 8, bf16 -> 16, int8/fp8 -> 32).
_SUBLANE_MULT = {4: 8, 2: 16, 1: 32}

_WIDTHS = (4096, 2048, 1024, 512, 256, 128)


def _gelu_kernel(x_ref, o_ref):
    # Load in native dtype, compute in f32 (v5e VPU/EUP has no bf16 datapath;
    # exact erf keeps parity with torch.erf).
    x = x_ref[...].astype(jnp.float32)
    inv_sqrt2 = jnp.float32(0.7071067811865476)  # 1/sqrt(2)
    # (1 + erf(x/sqrt2)) * x / 2  ==  0.5 * (x + x * erf(x * inv_sqrt2))
    y = (x + x * jax.lax.erf(x * inv_sqrt2)) * jnp.float32(0.5)
    o_ref[...] = y.astype(o_ref.dtype)


def _pick_width(n):
    """Pick a lane-dense slab width.

    Returns (width, exact_divisor). Preference order:
      1. width divides n exactly AND leaves >=16 rows (grid can split across TCs)
      2. width divides n exactly
      3. (ragged) largest width <= n  -> caller uses prefix + tail strategy
      4. None (n < 128): single tiny full-array block
    """
    for w in _WIDTHS:
        if n % w == 0 and n // w >= 16:
            return w, True
    for w in _WIDTHS:
        if n % w == 0:
            return w, True
    for w in _WIDTHS:
        if w <= n:
            return w, False
    return None, False


def _gelu_2d(x2d):
    """Run the GELU kernel over a 2-D (rows, w) slab, streaming row-blocks."""
    rows, w = x2d.shape
    itemsize = jnp.dtype(x2d.dtype).itemsize
    sub = _SUBLANE_MULT.get(itemsize, 8)

    # ~BLOCK_ELEMS elements per buffer, rounded down to the sublane packing.
    block_rows = max(sub, (BLOCK_ELEMS // w) // sub * sub)
    block_rows = min(rows, block_rows)

    # Ensure >=2 grid steps when possible so the "parallel" axis spans both
    # TensorCores on v7x (no effect on single-TC v5e/v6e). Partial last blocks
    # are handled by Pallas masking.
    if block_rows >= rows and rows > sub:
        half = pl.cdiv(rows, 2)
        block_rows = ((half + sub - 1) // sub) * sub

    grid = (pl.cdiv(rows, block_rows),)

    n_elems = rows * w
    cost = pl.CostEstimate(
        flops=10 * n_elems,
        transcendentals=n_elems,
        bytes_accessed=2 * n_elems * itemsize,
    )

    return pl.pallas_call(
        _gelu_kernel,
        out_shape=jax.ShapeDtypeStruct((rows, w), x2d.dtype),
        grid_spec=pltpu.PrefetchScalarGridSpec(
            num_scalar_prefetch=0,
            grid=grid,
            in_specs=[pl.BlockSpec((block_rows, w), lambda i: (i, 0))],
            out_specs=pl.BlockSpec((block_rows, w), lambda i: (i, 0)),
        ),
        compiler_params=pltpu.CompilerParams(
            dimension_semantics=("parallel",),
            vmem_limit_bytes=VMEM_LIMIT_BYTES,
        ),
        cost_estimate=cost,
    )(x2d)


def custom_gelu(x):
    """Elementwise exact GELU via a Pallas TPU kernel. Accepts any shape."""
    orig_shape = x.shape
    n = x.size
    if n == 0:
        return x
    x_flat = x.reshape(-1)

    w, exact = _pick_width(n)

    if w is None:
        # Tiny tensor (< 128 elements): one full-array block.
        return _gelu_2d(x_flat.reshape(1, n)).reshape(orig_shape)

    if exact:
        # Zero-copy reshape to a lane-dense slab; no pad / slice HBM passes.
        return _gelu_2d(x_flat.reshape(n // w, w)).reshape(orig_shape)

    # Ragged case: process the largest w-divisible prefix zero-copy and the
    # (< w)-element tail with a tiny second call; one concatenate reassembles.
    # This avoids the pad + slice round trips (~3x HBM traffic) of padding.
    n_main = (n // w) * w
    y_main = _gelu_2d(x_flat[:n_main].reshape(n_main // w, w)).reshape(-1)
    tail = n - n_main
    y_tail = _gelu_2d(x_flat[n_main:].reshape(1, tail)).reshape(-1)
    return jnp.concatenate([y_main, y_tail]).reshape(orig_shape)


def _reference_gelu(x):
    x32 = x.astype(jnp.float32)
    return (
        (1.0 + jax.lax.erf(x32 / jnp.sqrt(jnp.float32(2.0)))) * x32 / 2.0
    ).astype(x.dtype)


if __name__ == "__main__":
    key = jax.random.PRNGKey(0)
    # Shape consistent with a conv-style NCHW activation: batch=2, C=4, H=W=16
    x = jax.random.normal(key, (2, 4, 16, 16), dtype=jnp.float32)

    y = custom_gelu(x)
    jax.block_until_ready(y)

    y_ref = _reference_gelu(x)
    assert y.shape == x.shape and y.dtype == x.dtype
    assert jnp.allclose(y, y_ref, atol=1e-6, rtol=1e-6), "mismatch vs reference"

    # Exercise a shape that is NOT a multiple of 128 (ragged prefix+tail path).
    x2 = jax.random.normal(jax.random.PRNGKey(1), (3, 5, 7, 11), dtype=jnp.float32)
    y2 = custom_gelu(x2)
    jax.block_until_ready(y2)
    assert jnp.allclose(y2, _reference_gelu(x2), atol=1e-6, rtol=1e-6)

    # Exercise a larger slab that tiles into several blocks.
    x3 = jax.random.normal(jax.random.PRNGKey(2), (8, 256, 512), dtype=jnp.float32)
    y3 = custom_gelu(x3)
    jax.block_until_ready(y3)
    assert jnp.allclose(y3, _reference_gelu(x3), atol=1e-6, rtol=1e-6)

    print("KERNEL_OK")
</pallas_src>

<mosaic_0001>
module attributes {stable_mosaic.version = 11 : i64} {
  func.func @_gelu_kernel(%arg0: i32, %arg1: memref<8x128xf32, #tpu.memory_space<vmem>>, %arg2: memref<8x128xf32, #tpu.memory_space<vmem>>) attributes {dimension_semantics = [#tpu.dimension_semantics<parallel>], iteration_bounds = array<i64: 2>, scalar_prefetch = 0 : i64, scratch_operands = 0 : i64, tpu.core_type = #tpu.core_type<tc>, window_params = [{transform_indices = @transform_0, window_bounds = array<i64: 8, 128>}, {transform_indices = @transform_1, window_bounds = array<i64: 8, 128>}]} {
    %c0 = arith.constant 0 : index
    %c0_0 = arith.constant 0 : index
    %0 = vector.load %arg1[%c0, %c0_0] : memref<8x128xf32, #tpu.memory_space<vmem>>, vector<8x128xf32>
    %cst = arith.constant 0.707106769 : f32
    %1 = vector.broadcast %cst : f32 to vector<8x128xf32>
    %2 = arith.mulf %0, %1 : vector<8x128xf32>
    %3 = math.erf %2 : vector<8x128xf32>
    %4 = arith.mulf %0, %3 : vector<8x128xf32>
    %5 = arith.addf %0, %4 : vector<8x128xf32>
    %cst_1 = arith.constant 5.000000e-01 : f32
    %6 = vector.broadcast %cst_1 : f32 to vector<8x128xf32>
    %7 = arith.mulf %5, %6 : vector<8x128xf32>
    %c0_2 = arith.constant 0 : index
    %c0_3 = arith.constant 0 : index
    %8 = vector.load %arg2[%c0_2, %c0_3] : memref<8x128xf32, #tpu.memory_space<vmem>>, vector<8x128xf32>
    tpu.vector_store %arg2[%c0_2, %c0_3], %7 {strides = array<i32>} : memref<8x128xf32, #tpu.memory_space<vmem>>, vector<8x128xf32>,
    return
  }
  func.func @transform_0(%arg0: i32) -> (i32, i32) {
    %c0_i32 = arith.constant 0 : i32
    %c0_i32_0 = arith.constant 0 : i32
    return %arg0, %c0_i32 : i32, i32
  }
  func.func @transform_1(%arg0: i32) -> (i32, i32) {
    %c0_i32 = arith.constant 0 : i32
    %c0_i32_0 = arith.constant 0 : i32
    return %arg0, %c0_i32 : i32, i32
  }
}

</mosaic_0001>

<bundles_post_ra>
// kernel: tpu_custom_call.1
= control target key start
LH: loop header
LB: loop body
LE: loop exit
PB: predicated region body
PF: predicated region fallthrough
CT: control target
= control target key end

     0   :  { %6 = vsyncpa [#allocation3], 0  ;;  %s566_s0 = inlined_call_operand.hbm [shape: f32[16,128], index: 0, kind: input, shape index: {}]   ;;  %s567_s1 = inlined_call_operand.hbm [shape: f32[16,128], index: 1, kind: output, shape index: {}]  }
   0x1   :  { %8 = vsyncpa [#allocation3 + $0x1], 0 }
   0x2   :  { %9 = vsyncpa [#allocation4], 0 }
   0x3   :  { %11 = vsyncpa [#allocation4 + $0x1], 0  ;;  %s435_s6 = smov 0   ;;  %s437_s7 = smov 0  }
   0x4   :  { %s439_s8 = smov 0   ;;  %s441_s9 = smov 0  }
   0x5 LB: > { %s456_s10 = sadd.s32 4294967295, %s423_s9   ;;  %s266_s11 = sadd.s32 4294967294, %s423_s9   ;;  %s423_s9 = sphi %s441_s9, %s577_s9   ;;  %s419_s8 = sphi %s439_s8, %s576_s8   ;;  %s415_s7 = sphi %s437_s7, %s575_s7   ;;  %s411_s6 = sphi %s435_s6, %s574_s6  }
   0x6   : > { %s460_s12 = sadd.s32 1, %s423_s9   ;;  %s24_s13 = sadd.s32 1, %s419_s8 }
   0x7   : > { %s21_s14 = ssub.s32 %s423_s9, %s460_s12  ;;  %p31_p0 = scmp.ne.s32.totalorder %s419_s8, %s415_s7 }
   0x8   : > { %p22_p1 = scmp.eq.s32.totalorder %s21_s14, 0  ;;  %p32_p2 = scmp.eq.s32.totalorder %s423_s9, 0 }
   0x9   : > { %p37_p3 = scmp.ne.s32.totalorder %s415_s7, %s411_s6  ;;  %p38_p4 = scmp.eq.s32.totalorder %s456_s10, 0 }
   0xa   : > { %s472_s15 = scalar_select %p22_p1, %s419_s8, %s24_s13  }
   0xb   : > { %p474_p5 = por %p32_p2, %p31_p0  ;;  %p478_p6 = por %p38_p4, %p37_p3 }
   0xc   : > { %p61_p7 = scmp.eq.s32.totalorder %s456_s10, 1  ;;  %p67_p8 = scmp.eq.s32.totalorder %s266_s11, 1 }
   0xd   : > { %p291_p10 = scmp.lt.s32.totalorder %s423_s9, 2  ;;  %s87_s20 = sand.u32 1, %s419_s8  }
   0xe   : > { %p485_p11 = por %p61_p7, %p31_p0  ;;  %p489_p12 = por %p67_p8, %p37_p3 }
   0xf   : > { %s270_s21 = sshll.u32 %s423_s9, 3  ;;  %s269_s22 = sshll.u32 %s87_s20, 3 }
  0x10   : > { %s95_s25 = scalar_lea.hbm %s566_s0, %s270_s21  ;;  %s91_s27 = scalar_lea.vmem [#allocation2], %s269_s22 }
  0x11   : > { %s97_s26 = sshll.u32 %s95_s25, 4  ;;  %s99_s28 = sshll.u32 %s91_s27, 4  ;;  %s98_s26 = int_to_ptr.hbm [resolvable:$true] %s97_s26  ;;  %s100_s28 = int_to_ptr.vmem [resolvable:$true] %s99_s28 }
  0x12   : > { %p500_p13 = pnand %p291_p10, %p474_p5  ;;  %p271_p0 = scmp.ge.s32.totalorder %s423_s9, 1 }
  0x13   : > { %p104_p1 = scmp.lt.s32.totalorder %s423_s9, 3  ;;  %s88_s30 = scalar_lea.sflag [#allocation3], %s87_s20 }
  0x14   : > { %s327_s2 = sshra.s32 %s98_s26, 4  ;;  %p331_p3 = pneg %p500_p13  ;;  %s328_s2 = int_to_ptr.hbm [resolvable:$true] %s327_s2 }
  0x15   : > { %s329_s3 = scalar_lea.hbm %s328_s2, 8  ;;  %s334_s11 = scalar_lea.hbm %s566_s0, 16 }
  0x16   : > { %p330_p2 = scmp.ne.s32.totalorder %s328_s2, %s329_s3  ;;  %p335_p5 = scmp.lt.s32.totalorder %s328_s2, %s566_s0 }
  0x17   : > { %p336_p8 = scmp.lt.s32.totalorder %s334_s11, %s329_s3 }
  0x18   : > { %p332_p4 = pnand %p331_p3, %p330_p2 }
  0x19   : > { %p337_p10 = por %p336_p8, %p335_p5 }
  0x1a   : > { %p333_p7 = pneg %p332_p4 }
  0x1c   : > { %p338_p9 = pnand %p337_p10, %p333_p7 }
  0x1e   : > { %341 = shalt.err (!%p338_p9)
}
  0x1f   : > { %286 = dma.hbm_to_vmem [thread:$0]  (!%p500_p13), %s98_s26, 128, %s100_s28, %s88_s30  }
  0x20   : > { %p105_p2 = pnand %p271_p0, %p104_p1 }
  0x21   : > { %s521_s16 = sand.u32 (!%p105_p2), 1, %s415_s7  }
  0x22   : > { %108 = sbr.rel (%p105_p2) target bundleno = 97 (0x61), region = 24  ;;  %s272_s20 = sshll.u32 (!%p105_p2), %s521_s16, 3 }
  0x23   : > { %s111_s21 = scalar_lea.sflag (!%p105_p2), [#allocation3], %s521_s16  ;;  %s114_s22 = scalar_lea.vmem (!%p105_p2), [#allocation2], %s272_s20 }
  0x27   : > { %402 = dma.done.wait (%p478_p6), %s111_s21, 128  }
  0x28   : > { %404 = vsyncadd (%p478_p6), %s111_s21, 4294967168  ;;  %v134_v0 = vld [vmem:[%s114_s22] sm:$0xff]  ;;  %s276_s17 = sshll.u32 %s456_s10, 3  ;;  %s133_s26 = scalar_lea.vmem [#allocation5], %s272_s20 }
  0x29   : > { %v135_v1 = vmul.f32 0.70710677, %v134_v0  ;;  %s191_s25 = scalar_lea.hbm %s567_s1, %s276_s17  ;;  %s193_s27 = sshll.u32 %s133_s26, 4  ;;  %s194_s27 = int_to_ptr.vmem [resolvable:$true] %s193_s27 }
  0x2a   : > { %s195_s28 = sshll.u32 %s191_s25, 4  ;;  %s181_s29 = scalar_lea.sflag [#allocation4], %s521_s16  ;;  %s196_s28 = int_to_ptr.hbm [resolvable:$true] %s195_s28 }
  0x2b   : > { %v136_v2 = vmul.f32 %v135_v1, %v135_v1  ;;  %s371_s30 = sshra.s32 %s196_s28, 4  ;;  %s377_s4 = scalar_lea.hbm %s567_s1, 16  ;;  %s372_s30 = int_to_ptr.hbm [resolvable:$true] %s371_s30 }
  0x2c   : > { %s373_s10 = scalar_lea.hbm %s372_s30, 8  ;;  %p378_p0 = scmp.lt.s32.totalorder %s372_s30, %s567_s1 }
  0x2d   : > { %v137_v3 = vmin.f32 %v136_v2, 16.0  ;;  %p374_p6 = scmp.ne.s32.totalorder %s372_s30, %s373_s10  ;;  %p379_p1 = scmp.lt.s32.totalorder %s377_s4, %s373_s10 }
  0x2f   : > { %v138_v4 = vmul.f32 2.1237322e-06, %v137_v3  ;;  %v149_v5 = vmul.f32 3.8918573e-05, %v137_v3  ;;  %p375_p9 = pnand %p374_p6, %p485_p11  ;;  %p380_p3 = por %p379_p1, %p378_p0 }
  0x31   : > { %v139_v6 = vadd.f32 0.00028619796, %v138_v4  ;;  %v150_v7 = vadd.f32 0.001143296, %v149_v5  ;;  %p376_p13 = pneg %p375_p9 }
  0x33   : > { %v140_v8 = vmul.f32 %v139_v6, %v137_v3  ;;  %v151_v9 = vmul.f32 %v150_v7, %v137_v3  ;;  %p381_p4 = pnand %p380_p3, %p376_p13 }
  0x35   : > { %v141_v10 = vadd.f32 0.0036580483, %v140_v8  ;;  %v152_v11 = vadd.f32 0.014752088, %v151_v9 }
  0x37   : > { %v142_v12 = vmul.f32 %v141_v10, %v137_v3  ;;  %v153_v13 = vmul.f32 %v152_v11, %v137_v3 }
  0x39   : > { %v154_v14 = vadd.f32 0.112945676, %v153_v13  ;;  %v143_v15 = vadd.f32 0.05243302, %v142_v12 }
  0x3b   : > { %v155_v16 = vmul.f32 %v154_v14, %v137_v3  ;;  %v144_v18 = vmul.f32 %v143_v15, %v137_v3 }
  0x3d   : > { %v156_v17 = vadd.f32 0.4994258, %v155_v16  ;;  %v145_v21 = vadd.f32 0.18741608, %v144_v18 }
  0x3f   : > { %v157_v19 = vmul.f32 %v156_v17, %v137_v3  ;;  %v146_v22 = vmul.f32 %v145_v21, %v137_v3 }
  0x41   : > { %v158_v20 = vadd.f32 1.0, %v157_v19  ;;  %v147_v25 = vadd.f32 1.1283791, %v146_v22 }
  0x43   : > { %325 = vrcp.f32 %v158_v20  ;;  %v170_v26 = vand.u32 2147483648, %v158_v20  ;;  %vm164_vm0 = vweird.f32 %v158_v20  ;;  %v168_v28 = vand.u32 2147483647, %v158_v20 }
  0x44   : > { %v148_v31 = vmul.f32 %v147_v25, %v135_v1 }
  0x45   : > { %v171_v30 = vor.u32 1.1754944e-38, %v170_v26  ;;  %vm169_vm3 = vcmp.eq.f32.partialorder %v168_v28, 8.507059e+37 }
  0x49   : > { %v326_v23 = vpop.eup %325 }
  0x4a   : > { %v160_v24 = vmul.f32 %v326_v23, %v158_v20  ;;  %vm165_vm1 = vweird.f32 %v326_v23 }
  0x4b   : > { %vm166_vm2 = vmor %vm164_vm0, %vm165_vm1 }
  0x4c   : > { %v161_v27 = vsub.f32 1.0, %v160_v24 }
  0x4e   : > { %v162_v29 = vmul.f32 %v326_v23, %v161_v27 }
  0x50   : > { %v163_v32 = vadd.f32 %v326_v23, %v162_v29 }
  0x52   : > { %v167_v33 = vsel %vm166_vm2, %v326_v23, %v163_v32 }
  0x53   : > { %v172_v34 = vsel %vm169_vm3, %v171_v30, %v167_v33 }
  0x54   : > { %v173_v35 = vmul.f32 %v172_v34, %v148_v31 }
  0x56   : > { %v274_v36 = vclamps-f32 %v173_v35, 1.0 }
  0x58   : > { %v176_v37 = vmul.f32 %v274_v36, %v134_v0 }
  0x5a   : > { %v177_v38 = vadd.f32 %v176_v37, %v134_v0 }
  0x5c   : > { %v178_v39 = vmul.f32 0.5, %v177_v38 }
  0x5e   : > { %179 = vst [vmem:[%s133_s26] sm:$0xff] %v178_v39 }
  0x5f   : > { %384 = shalt.err (!%p381_p4)
}
  0x60   : > { %281 = dma.vmem_to_hbm [thread:$0]  (%p485_p11), %s194_s27, 128, %s196_s28, %s181_s29  }
  0x61 PF: > { %s207_s13 = sand.u32 1, %s411_s6   ;;  %p573_p7 = scmp.ge.s32.totalorder %s423_s9, 2 }
  0x62   : > { %s208_s14 = scalar_lea.sflag [#allocation4], %s207_s13 }
  0x63   : > { %p288_p5 = pnand %p573_p7, %p489_p12 }
  0x65   : > { %p289_p8 = pneg %p288_p5 }
  0x67   : > { %406 = dma.done.wait (%p289_p8), %s208_s14, 128  }
  0x68   : > { %408 = vsyncadd (%p289_p8), %s208_s14, 4294967168  ;;  %p14_p10 = scmp.ge.s32.totalorder %s460_s12, 4   ;;  %s574_s6 = smov %s415_s7 }
  0x69   : > { %s575_s7 = smov %s419_s8  ;;  %s576_s8 = smov %s472_s15 }
  0x6a   : > { %s577_s9 = smov %s460_s12  ;;  %16 = sbr.rel (!%p14_p10) target bundleno = 5 (0x5), region = 69 }
  0x6f   :  { %214 = vsyncpa [#allocation3], 1 }
  0x70   :  { %216 = vsyncpa [#allocation3 + $0x1], 1 }
  0x71   :  { %217 = vsyncpa [#allocation4], 1 }
  0x72   :  { %219 = vsyncpa [#allocation4 + $0x1], 1 }

</bundles_post_ra>
